<compile_context>
chip_gen: v7x
topology: tpu7x:2x2x1
jax: 0.10.0
libtpu: 0.0.40
codegen_flags: <defaults>
</compile_context>

<pallas_src>
import jax
import jax.numpy as jnp
from jax import lax
from jax.experimental import pallas as pl
from jax.experimental.pallas import tpu as pltpu

INPUT_SIZE = 1
HIDDEN1 = 64
HIDDEN2 = 64
OUTPUT_SIZE = 1

_LANE = 128          # lane width: lane-axis tiles must be multiples of this
_CHUNK = 256         # inner chunk: (64, 256) f32 = 16 vregs, so h1/h2 stay in registers
_MAX_TILE_N = 8192   # (1, 8192) f32 I/O rows are tiny; intermediates live per-chunk in vregs


def _mlp_kernel(x_ref, pk_ref, w2t_ref, b3_ref, o_ref):
    tile_n = x_ref.shape[1]
    # Chunk of the lane (batch) axis processed fully in registers per iteration.
    chunk = _CHUNK if tile_n % _CHUNK == 0 else _LANE
    n_chunks = tile_n // chunk

    # Packed per-feature params: columns are [w1, b1, b2, w3], each a (64, 1) column.
    pk = pk_ref[...]                       # (64, 4)
    w1c = pk[:, 0:1]
    b1c = pk[:, 1:2]
    b2c = pk[:, 2:3]
    w3c = pk[:, 3:4]
    w2t = w2t_ref[...]                     # (64, 64), out-major; f32 or bf16
    b3 = b3_ref[0]                         # scalar bias from SMEM

    def body(c, carry):
        off = pl.multiple_of(c * chunk, chunk)
        xc = x_ref[:, pl.ds(off, chunk)]                          # (1, chunk), batch on lanes

        # Layer 1: in_features == 1 -> outer product on the VPU (no degenerate K=1 MXU call).
        h1 = jnp.maximum(w1c * xc + b1c, 0.0)                     # (64, chunk)

        # Layer 2: the only MXU matmul, (64,64) @ (64,chunk), f32 accumulation.
        h2 = jnp.dot(w2t, h1.astype(w2t.dtype),
                     preferred_element_type=jnp.float32) + b2c    # (64, chunk)
        h2 = jnp.maximum(h2, 0.0)

        # Layer 3 (M=1): per-feature scale + sublane reduction on VPU/XLU instead of the MXU.
        out = jnp.sum(w3c * h2, axis=0, keepdims=True) + b3       # (1, chunk)
        o_ref[:, pl.ds(off, chunk)] = out.astype(o_ref.dtype)     # lane-dense store
        return carry

    lax.fori_loop(0, n_chunks, body, 0, unroll=min(n_chunks, 8))


def _pick_tile(n):
    """Lane-aligned tile; keep >=2 grid steps when possible (v7x megacore), cap at _MAX_TILE_N."""
    return _LANE * max(1, min(_MAX_TILE_N // _LANE, pl.cdiv(n, 2 * _LANE)))


def log_nn_forward(x, params, *, tile_n=None, use_bf16_matmul=False):
    """x: (N, 1) float32. params: dict of w1,b1,w2,b2,w3,b3 in PyTorch-like (in,out) layout."""
    N, F = x.shape
    assert F == INPUT_SIZE
    if tile_n is None:
        tile_n = _pick_tile(N)
    assert tile_n % _LANE == 0, "lane-axis tile must be a multiple of 128"

    # Pad batch to a multiple of the tile; padded lanes are sliced off afterwards.
    n_pad = pl.cdiv(N, tile_n) * tile_n
    x_row = x.reshape(1, N).astype(jnp.float32)
    if n_pad != N:
        x_row = jnp.pad(x_row, ((0, 0), (0, n_pad - N)))

    # Pack the small per-feature params into one (64, 4) array (single VMEM tile).
    packed = jnp.concatenate(
        [params["w1"].reshape(HIDDEN1, 1),
         params["b1"].reshape(HIDDEN1, 1),
         params["b2"].reshape(HIDDEN2, 1),
         params["w3"].reshape(HIDDEN2, 1)],
        axis=1,
    ).astype(jnp.float32)

    mx_dtype = jnp.bfloat16 if use_bf16_matmul else jnp.float32
    w2t = params["w2"].T.astype(mx_dtype)        # (64, 64), out-major
    b3 = params["b3"].reshape(1).astype(jnp.float32)

    grid = (n_pad // tile_n,)
    # NOTE: at these tile sizes VMEM use is trivial on v5e/v6e/v7x; only set vmem_limit_bytes
    # explicitly if _MAX_TILE_N is ever pushed past ~16K lanes.
    out_row = pl.pallas_call(
        _mlp_kernel,
        out_shape=jax.ShapeDtypeStruct((1, n_pad), jnp.float32),
        grid_spec=pltpu.PrefetchScalarGridSpec(
            num_scalar_prefetch=0,
            grid=grid,
            in_specs=[
                pl.BlockSpec((1, tile_n), lambda i: (0, i)),          # x row, lane-dense
                pl.BlockSpec(packed.shape, lambda i: (0, 0)),         # packed per-feature params
                pl.BlockSpec(w2t.shape, lambda i: (0, 0)),            # layer-2 weights
                pl.BlockSpec(memory_space=pltpu.MemorySpace.SMEM),    # b3 scalar in SMEM
            ],
            out_specs=pl.BlockSpec((1, tile_n), lambda i: (0, i)),    # lane-dense output
        ),
        compiler_params=pltpu.CompilerParams(
            dimension_semantics=("parallel",),
        ),
    )(x_row, packed, w2t, b3)

    return out_row[:, :N].reshape(N, OUTPUT_SIZE)


def init_params(key):
    """Deterministic init mimicking nn.Linear default (U(-1/sqrt(fan_in), 1/sqrt(fan_in)))."""
    ks = jax.random.split(key, 6)

    def linear(kw, kb, fan_in, fan_out):
        bound = 1.0 / jnp.sqrt(fan_in)
        w = jax.random.uniform(kw, (fan_in, fan_out), jnp.float32, -bound, bound)
        b = jax.random.uniform(kb, (1, fan_out), jnp.float32, -bound, bound)
        return w, b

    w1, b1 = linear(ks[0], ks[1], INPUT_SIZE, HIDDEN1)
    w2, b2 = linear(ks[2], ks[3], HIDDEN1, HIDDEN2)
    w3, b3 = linear(ks[4], ks[5], HIDDEN2, OUTPUT_SIZE)
    return {"w1": w1, "b1": b1, "w2": w2, "b2": b2, "w3": w3, "b3": b3}


def log_nn_reference(x, p):
    h1 = jnp.maximum(x @ p["w1"] + p["b1"], 0.0)
    h2 = jnp.maximum(h1 @ p["w2"] + p["b2"], 0.0)
    return h2 @ p["w3"] + p["b3"]


if __name__ == "__main__":
    key = jax.random.PRNGKey(0)
    kp, _ = jax.random.split(key)
    params = init_params(kp)

    # Mirror the script's x = np.linspace(1, 10, 1000) fed as an (N, 1) column.
    N = 1000
    x = jnp.linspace(1.0, 10.0, N, dtype=jnp.float32).reshape(N, 1)

    out = jax.block_until_ready(log_nn_forward(x, params))
    ref = log_nn_reference(x, params)
    assert out.shape == (N, OUTPUT_SIZE)
    assert jnp.allclose(out, ref, atol=1e-4, rtol=1e-5), "mismatch vs reference (f32)"

    # Exercise the padded / fallback-chunk path (tile not a multiple of 256).
    N2 = 600
    x2 = jnp.linspace(1.0, 10.0, N2, dtype=jnp.float32).reshape(N2, 1)
    out2 = jax.block_until_ready(log_nn_forward(x2, params))
    ref2 = log_nn_reference(x2, params)
    assert out2.shape == (N2, OUTPUT_SIZE)
    assert jnp.allclose(out2, ref2, atol=1e-4, rtol=1e-5), "mismatch vs reference (padded)"

    # bf16 MXU-operand fast path (v6e/v7x); f32 accumulation, looser tolerance vs f32 reference.
    out3 = jax.block_until_ready(log_nn_forward(x, params, use_bf16_matmul=True))
    assert jnp.allclose(out3, ref, atol=1e-1, rtol=2e-2), "mismatch vs reference (bf16 operands)"

    print("KERNEL_OK")
</pallas_src>

<mosaic_0001>
module attributes {stable_mosaic.version = 11 : i64} {
  func.func @_mlp_kernel(%arg0: i32, %arg1: memref<1x512xf32, #tpu.memory_space<vmem>>, %arg2: memref<64x4xf32, #tpu.memory_space<vmem>>, %arg3: memref<64x64xf32, #tpu.memory_space<vmem>>, %arg4: memref<1xf32, #tpu.memory_space<smem>>, %arg5: memref<1x512xf32, #tpu.memory_space<vmem>>) attributes {dimension_semantics = [#tpu.dimension_semantics<parallel>], iteration_bounds = array<i64: 2>, scalar_prefetch = 0 : i64, scratch_operands = 0 : i64, tpu.core_type = #tpu.core_type<tc>, window_params = [{transform_indices = @transform_0, window_bounds = array<i64: 1, 512>}, {pipeline_mode = #tpu.pipeline_mode<synchronous>, transform_indices = @transform_1, window_bounds = array<i64: 64, 4>}, {pipeline_mode = #tpu.pipeline_mode<synchronous>, transform_indices = @transform_2, window_bounds = array<i64: 64, 64>}, {transform_indices = @transform_3, window_bounds = array<i64: 1>}, {transform_indices = @transform_4, window_bounds = array<i64: 1, 512>}]} {
    %c0 = arith.constant 0 : index
    %c0_0 = arith.constant 0 : index
    %0 = vector.load %arg2[%c0, %c0_0] : memref<64x4xf32, #tpu.memory_space<vmem>>, vector<64x4xf32>
    %1 = vector.extract_strided_slice %0 {offsets = [0, 0], sizes = [64, 1], strides = [1, 1]} : vector<64x4xf32> to vector<64x1xf32>
    %2 = vector.extract_strided_slice %0 {offsets = [0, 1], sizes = [64, 1], strides = [1, 1]} : vector<64x4xf32> to vector<64x1xf32>
    %3 = vector.extract_strided_slice %0 {offsets = [0, 2], sizes = [64, 1], strides = [1, 1]} : vector<64x4xf32> to vector<64x1xf32>
    %4 = vector.extract_strided_slice %0 {offsets = [0, 3], sizes = [64, 1], strides = [1, 1]} : vector<64x4xf32> to vector<64x1xf32>
    %c0_1 = arith.constant 0 : index
    %c0_2 = arith.constant 0 : index
    %5 = vector.load %arg3[%c0_1, %c0_2] : memref<64x64xf32, #tpu.memory_space<vmem>>, vector<64x64xf32>
    %c0_3 = arith.constant 0 : index
    %6 = memref.load %arg4[%c0_3] : memref<1xf32, #tpu.memory_space<smem>>
    %c0_i32 = arith.constant 0 : i32
    %c256_i32 = arith.constant 256 : i32
    %7 = arith.muli %c0_i32, %c256_i32 : i32
    %8 = tpu.assume_multiple %7, 256 : i32
    %c0_4 = arith.constant 0 : index
    %9 = arith.index_cast %8 : i32 to index
    %10 = vector.load %arg1[%c0_4, %9] : memref<1x512xf32, #tpu.memory_space<vmem>>, vector<1x256xf32>
    %11 = vector.broadcast %1 : vector<64x1xf32> to vector<64x256xf32>
    %12 = vector.broadcast %10 : vector<1x256xf32> to vector<64x256xf32>
    %13 = arith.mulf %11, %12 : vector<64x256xf32>
    %14 = vector.broadcast %2 : vector<64x1xf32> to vector<64x256xf32>
    %15 = arith.addf %13, %14 : vector<64x256xf32>
    %cst = arith.constant 0.000000e+00 : f32
    %16 = vector.broadcast %cst : f32 to vector<64x256xf32>
    %17 = arith.maximumf %15, %16 : vector<64x256xf32>
    %cst_5 = arith.constant dense<0.000000e+00> : vector<64x256xf32>
    %18 = tpu.matmul %5, %17, %cst_5 {dimension_numbers = #tpu.dot_dimension_numbers<[1], [0], [0], [1], [0, 0, 1, 1], [], []>} : vector<64x64xf32>, vector<64x256xf32>, vector<64x256xf32> -> vector<64x256xf32>
    %19 = vector.broadcast %3 : vector<64x1xf32> to vector<64x256xf32>
    %20 = arith.addf %18, %19 : vector<64x256xf32>
    %cst_6 = arith.constant 0.000000e+00 : f32
    %21 = vector.broadcast %cst_6 : f32 to vector<64x256xf32>
    %22 = arith.maximumf %20, %21 : vector<64x256xf32>
    %23 = vector.broadcast %4 : vector<64x1xf32> to vector<64x256xf32>
    %24 = arith.mulf %23, %22 : vector<64x256xf32>
    %cst_7 = arith.constant dense<0.000000e+00> : vector<256xf32>
    %25 = vector.multi_reduction <add>, %24, %cst_7 [0] : vector<64x256xf32> to vector<256xf32>
    %26 = vector.shape_cast %25 : vector<256xf32> to vector<1x256xf32>
    %27 = vector.broadcast %6 : f32 to vector<1x256xf32>
    %28 = arith.addf %26, %27 : vector<1x256xf32>
    %c0_8 = arith.constant 0 : index
    %29 = arith.index_cast %8 : i32 to index
    %30 = vector.load %arg5[%c0_8, %29] : memref<1x512xf32, #tpu.memory_space<vmem>>, vector<1x256xf32>
    tpu.vector_store %arg5[%c0_8, %29], %28 {strides = array<i32>} : memref<1x512xf32, #tpu.memory_space<vmem>>, vector<1x256xf32>,
    %c1_i32 = arith.constant 1 : i32
    %c256_i32_9 = arith.constant 256 : i32
    %31 = arith.muli %c1_i32, %c256_i32_9 : i32
    %32 = tpu.assume_multiple %31, 256 : i32
    %c0_10 = arith.constant 0 : index
    %33 = arith.index_cast %32 : i32 to index
    %34 = vector.load %arg1[%c0_10, %33] : memref<1x512xf32, #tpu.memory_space<vmem>>, vector<1x256xf32>
    %35 = vector.broadcast %1 : vector<64x1xf32> to vector<64x256xf32>
    %36 = vector.broadcast %34 : vector<1x256xf32> to vector<64x256xf32>
    %37 = arith.mulf %35, %36 : vector<64x256xf32>
    %38 = vector.broadcast %2 : vector<64x1xf32> to vector<64x256xf32>
    %39 = arith.addf %37, %38 : vector<64x256xf32>
    %cst_11 = arith.constant 0.000000e+00 : f32
    %40 = vector.broadcast %cst_11 : f32 to vector<64x256xf32>
    %41 = arith.maximumf %39, %40 : vector<64x256xf32>
    %cst_12 = arith.constant dense<0.000000e+00> : vector<64x256xf32>
    %42 = tpu.matmul %5, %41, %cst_12 {dimension_numbers = #tpu.dot_dimension_numbers<[1], [0], [0], [1], [0, 0, 1, 1], [], []>} : vector<64x64xf32>, vector<64x256xf32>, vector<64x256xf32> -> vector<64x256xf32>
    %43 = vector.broadcast %3 : vector<64x1xf32> to vector<64x256xf32>
    %44 = arith.addf %42, %43 : vector<64x256xf32>
    %cst_13 = arith.constant 0.000000e+00 : f32
    %45 = vector.broadcast %cst_13 : f32 to vector<64x256xf32>
    %46 = arith.maximumf %44, %45 : vector<64x256xf32>
    %47 = vector.broadcast %4 : vector<64x1xf32> to vector<64x256xf32>
    %48 = arith.mulf %47, %46 : vector<64x256xf32>
    %cst_14 = arith.constant dense<0.000000e+00> : vector<256xf32>
    %49 = vector.multi_reduction <add>, %48, %cst_14 [0] : vector<64x256xf32> to vector<256xf32>
    %50 = vector.shape_cast %49 : vector<256xf32> to vector<1x256xf32>
    %51 = vector.broadcast %6 : f32 to vector<1x256xf32>
    %52 = arith.addf %50, %51 : vector<1x256xf32>
    %c0_15 = arith.constant 0 : index
    %53 = arith.index_cast %32 : i32 to index
    %54 = vector.load %arg5[%c0_15, %53] : memref<1x512xf32, #tpu.memory_space<vmem>>, vector<1x256xf32>
    tpu.vector_store %arg5[%c0_15, %53], %52 {strides = array<i32>} : memref<1x512xf32, #tpu.memory_space<vmem>>, vector<1x256xf32>,
    %c2_i32 = arith.constant 2 : i32
    return
  }
  func.func @transform_0(%arg0: i32) -> (i32, i32) {
    %c0_i32 = arith.constant 0 : i32
    %c0_i32_0 = arith.constant 0 : i32
    return %c0_i32, %arg0 : i32, i32
  }
  func.func @transform_1(%arg0: i32) -> (i32, i32) {
    %c0_i32 = arith.constant 0 : i32
    %c0_i32_0 = arith.constant 0 : i32
    %c0_i32_1 = arith.constant 0 : i32
    return %c0_i32, %c0_i32_0 : i32, i32
  }
  func.func @transform_2(%arg0: i32) -> (i32, i32) {
    %c0_i32 = arith.constant 0 : i32
    %c0_i32_0 = arith.constant 0 : i32
    %c0_i32_1 = arith.constant 0 : i32
    return %c0_i32, %c0_i32_0 : i32, i32
  }
  func.func @transform_3(%arg0: i32) -> i32 {
    %c0_i32 = arith.constant 0 : i32
    %c0_i32_0 = arith.constant 0 : i32
    return %c0_i32 : i32
  }
  func.func @transform_4(%arg0: i32) -> (i32, i32) {
    %c0_i32 = arith.constant 0 : i32
    %c0_i32_0 = arith.constant 0 : i32
    return %c0_i32, %arg0 : i32, i32
  }
}

</mosaic_0001>

<bundles_post_ra>
// kernel: tpu_custom_call.1
= control target key start
LH: loop header
LB: loop body
LE: loop exit
PB: predicated region body
PF: predicated region fallthrough
CT: control target
= control target key end

     0   :  { %s1433_s0 = inlined_call_operand.vmem [shape: f32[1,1024], index: 0, kind: input, shape index: {}]   ;;  %s1434_s1 = inlined_call_operand.vmem [shape: f32[64,4], index: 1, kind: input, shape index: {}]   ;;  %s1435_s2 = inlined_call_operand.vmem [shape: f32[64,64], index: 2, kind: input, shape index: {}]   ;;  %s1436_s3 = inlined_call_operand.<no memory space> [shape: f32[1], index: 3, kind: input, shape index: {}]   ;;  %s1437_s4 = inlined_call_operand.hbm [shape: f32[1,1024], index: 4, kind: output, shape index: {}]  }
   0x1   :  { %9 = sst [smem:[#allocation2]] %s1436_s3 }
   0x2   :  { %10 = vsyncpa [#allocation4], 0 }
   0x3   :  { %12 = vsyncpa [#allocation4 + $0x1], 0  ;;  %s1179_s17 = smov 0   ;;  %s1181_s18 = smov 0  }
   0x4   :  { %s1183_s19 = smov 0   ;;  %s1185_s20 = smov 0  }
   0x5 LB: > { %s1200_s3 = sadd.s32 4294967295, %s1142_s20   ;;  %s957_s21 = sadd.s32 4294967294, %s1142_s20   ;;  %s1142_s20 = sphi %s1185_s20, %s1443_s20   ;;  %s1138_s19 = sphi %s1183_s19, %s1442_s19   ;;  %s1134_s18 = sphi %s1181_s18, %s1441_s18   ;;  %s1130_s17 = sphi %s1179_s17, %s1440_s17  }
   0x6   : > { %s1204_s22 = sadd.s32 1, %s1142_s20   ;;  %s114_s23 = sadd.s32 1, %s1138_s19 }
   0x7   : > { %s111_s24 = ssub.s32 %s1142_s20, %s1204_s22  ;;  %p124_p0 = scmp.ne.s32.totalorder %s1138_s19, %s1134_s18 }
   0x8   : > { %p112_p1 = scmp.eq.s32.totalorder %s111_s24, 0  ;;  %p125_p2 = scmp.eq.s32.totalorder %s1200_s3, 1 }
   0x9   : > { %p130_p3 = scmp.ne.s32.totalorder %s1134_s18, %s1130_s17  ;;  %p131_p4 = scmp.eq.s32.totalorder %s957_s21, 1 }
   0xa   : > { %s1215_s25 = scalar_select %p112_p1, %s1138_s19, %s114_s23  }
   0xb   : > { %p1217_p5 = por %p125_p2, %p124_p0  ;;  %p1221_p6 = por %p131_p4, %p130_p3 }
   0xc   : > { %p960_p7 = scmp.ge.s32.totalorder %s1142_s20, 1  ;;  %p166_p8 = scmp.lt.s32.totalorder %s1142_s20, 3 }
   0xe   : > { %p167_p9 = pnand %p960_p7, %p166_p8 }
   0xf   : > { %v199_v0 = vld [vmem:[%s1434_s1 + $0x10] sm:$0xff] (!%p167_p9)  ;;  %v197_v1 = vld [vmem:[%s1434_s1] sm:$0xff] (!%p167_p9)  ;;  %v1144_v2 = vmov (!%p167_p9), 1   ;;  %v198_v3 = vld [vmem:[%s1434_s1 + $0x8] sm:$0xff] (!%p167_p9)  ;;  %v1145_v4 = vmov (!%p167_p9), 0   ;;  %v1146_v10 = vmov (!%p167_p9), 0.0   ;;  %v256_v13 = vlaneseq (!%p167_p9) }
  0x10   : > { %170 = sbr.rel (%p167_p9) target bundleno = 476 (0x1dc), region = 36  ;;  %1066 = vset.pattern.permute.xlu0 (!%p167_p9), %v1144_v2  ;;  %1064 = vset.pattern.permute.xlu1 (!%p167_p9), %v1144_v2  ;;  %v200_v5 = vld [vmem:[%s1434_s1 + $0x18] sm:$0xff] (!%p167_p9)  ;;  %v202_v6 = vld [vmem:[%s1434_s1 + $0x28] sm:$0xff] (!%p167_p9)  ;;  %v201_v7 = vld [vmem:[%s1434_s1 + $0x20] sm:$0xff] (!%p167_p9)  ;;  %v1147_v11 = vmov (!%p167_p9), 2   ;;  %v1148_v12 = vmov (!%p167_p9), 3  }
  0x11   : > { %291 = vperm.xlu0 (!%p167_p9), %1066, %v199_v0   ;;  %283 = vperm.xlu1 (!%p167_p9), %1064, %v197_v1   ;;  %v203_v8 = vld [vmem:[%s1434_s1 + $0x30] sm:$0xff] (!%p167_p9)  ;;  %v204_v9 = vld [vmem:[%s1434_s1 + $0x38] sm:$0xff] (!%p167_p9)  ;;  %s962_s23 = sshll.u32 (!%p167_p9), %s1200_s3, 2  ;;  %v1255_v14 = vshrl.u32 (!%p167_p9), %v256_v13, 7  ;;  %vm378_vm0 = vcmask (!%p167_p9), 523264   ;;  %s213_s28 = sld [smem:[#allocation2]] (!%p167_p9) }
  0x12   : > { %467 = vmatprep.mubr.f32.mxu0 (!%p167_p9), %v1146_v10  ;;  %757 = vmatprep.mubr.f32.mxu1 (!%p167_p9), %v1146_v10  ;;  %p192_p10 = scmp.lt.s32.totalorder (!%p167_p9), %s962_s23, 7  ;;  %s986_s5 = sshll.u32 (!%p167_p9), %s1200_s3, 6  ;;  %vm629_vm1 = vcmp.lt.s32.totalorder (!%p167_p9), %v256_v13, 256 }
  0x13   : > { %v262_v15 = vsub.s32 (!%p167_p9), 1, %v1255_v14  ;;  %v258_v18 = vsub.s32 (!%p167_p9), 0, %v1255_v14  ;;  %s1389_s10 = scalar_lea.hbm (!%p167_p9), %s1437_s4, %s986_s5  ;;  %s1150_s12 = smov (!%p167_p9), [#allocation3]  }
  0x14   : > { %s1084_s13 = sshll.u32 (!%p167_p9), %s1150_s12, 4  ;;  %s1085_s13 = int_to_ptr.vmem [resolvable:$false] %s1084_s13 }
  0x15   : > { %1067 = vset.pattern.permute.xlu0 (!%p167_p9), %v1145_v4  ;;  %287 = vperm.xlu1 (!%p167_p9), %1064, %v198_v3   ;;  %s1086_s14 = scalar_lea.vmem (!%p167_p9), %s1085_s13, 128 }
  0x16   : > { %217 = vperm.xlu0 (!%p167_p9), %1067, %v197_v1  }
  0x17   : > { %s1445_s23 = smov (!%p192_p10, %s962_s23), 7 }
  0x18   : > { %s194_s29 = scalar_lea.vmem %s1433_s0, %s1445_s23 }
  0x19   : > { %1065 = vset.pattern.permute.xlu1 %v1145_v4  ;;  %v214_v19 = vld [vmem:[%s194_s29] sm:$0x3]  ;;  %v971_v20 = vld [vmem:[%s194_s29 + $0x2] sm:$0x3]  ;;  %s188_s29 = sand.u32 1, %s1134_s18  }
  0x1a   : > { %222 = vperm.xlu0 %1067, %v198_v3   ;;  %232 = vperm.xlu1 %1065, %v200_v5   ;;  %v1264_v21 = vrot.slane %v214_v19, %v262_v15  ;;  %v1266_v23 = vrot.slane %v214_v19, %v258_v18  ;;  %v1268_v24 = vrot.slane %v971_v20, %v262_v15  ;;  %s961_s30 = sshll.u32 %s188_s29, 2  ;;  %s887_s3 = scalar_lea.sflag [#allocation4], %s188_s29 }
  0x1b   : > { %v1270_v26 = vrot.slane %v971_v20, %v258_v18  ;;  %s190_s6 = scalar_lea.vmem [#allocation3], %s961_s30 }
  0x1c   : > { %s901_s7 = sshll.u32 %s190_s6, 4  ;;  %s1391_s7 = int_to_ptr.vmem [resolvable:$true] %s901_s7 }
  0x1d   : > { %s1080_s11 = scalar_lea.vmem %s1391_s7, 64  ;;  %p1087_p0 = scmp.lt.s32.totalorder %s1391_s7, %s1085_s13 }
  0x1e   : > { %227 = vperm.xlu0 %1067, %v199_v0   ;;  %1068 = vset.pattern.permute.xlu1 %v1144_v2  ;;  %p1081_p11 = scmp.ne.s32.totalorder %s1391_s7, %s1080_s11  ;;  %p1088_p1 = scmp.lt.s32.totalorder %s1086_s14, %s1080_s11 }
  0x1f   : > { %295 = vperm.xlu1 %1068, %v200_v5  }
  0x20   : > { %p1082_p12 = pnand %p1081_p11, %p1217_p5  ;;  %p1089_p2 = por %p1088_p1, %p1087_p0 }
  0x22   : > { %242 = vperm.xlu0 %1067, %v202_v6   ;;  %p1083_p13 = pneg %p1082_p12 }
  0x23   : > { %1069 = vset.pattern.permute.xlu1 %v1145_v4 }
  0x24   : > { %237 = vperm.xlu1 %1069, %v201_v7   ;;  %p1090_p3 = pnand %p1089_p2, %p1083_p13 }
  0x26   : > { %247 = vperm.xlu0 %1067, %v203_v8  }
  0x28   : > { %1070 = vset.pattern.permute.xlu1 %v1144_v2 }
  0x29   : > { %299 = vperm.xlu1 %1070, %v201_v7  }
  0x2a   : > { %1072 = vset.pattern.permute.xlu0 %v1144_v2 }
  0x2b   : > { %307 = vperm.xlu0 %1072, %v203_v8  }
  0x2d   : > { %303 = vperm.xlu1 %1070, %v202_v6  }
  0x2f   : > { %1075 = vset.pattern.permute.xlu0 %v1147_v11 }
  0x30   : > { %351 = vperm.xlu0 %1075, %v198_v3  }
  0x31   : > { %1071 = vset.pattern.permute.xlu1 %v1145_v4 }
  0x32   : > { %252 = vperm.xlu1 %1071, %v204_v9  }
  0x34   : > { %1076 = vset.pattern.permute.xlu0 %v1148_v12 }
  0x35   : > { %533 = vperm.xlu0 %1076, %v197_v1  }
  0x36   : > { %1073 = vset.pattern.permute.xlu1 %v1144_v2 }
  0x37   : > { %311 = vperm.xlu1 %1073, %v204_v9  }
  0x39   : > { %541 = vperm.xlu0 %1076, %v199_v0  }
  0x3b   : > { %1074 = vset.pattern.permute.xlu1 %v1147_v11 }
  0x3c   : > { %347 = vperm.xlu1 %1074, %v197_v1  }
  0x3d   : > { %545 = vperm.xlu0 %1076, %v200_v5  }
  0x40   : > { %355 = vperm.xlu1 %1074, %v199_v0  }
  0x41   : > { %549 = vperm.xlu0 %1076, %v201_v7  }
  0x44   : > { %359 = vperm.xlu1 %1074, %v200_v5  }
  0x45   : > { %553 = vperm.xlu0 %1076, %v202_v6  }
  0x48   : > { %1077 = vset.pattern.permute.xlu1 %v1148_v12 }
  0x49   : > { %537 = vperm.xlu1 %1077, %v198_v3   ;;  %561 = vperm.xlu0 %1076, %v204_v9  }
  0x4d   : > { %1078 = vset.pattern.permute.xlu1 %v1147_v11 }
  0x4e   : > { %363 = vperm.xlu1 %1078, %v201_v7  }
  0x52   : > { %367 = vperm.xlu1 %1078, %v202_v6  }
  0x56   : > { %371 = vperm.xlu1 %1078, %v203_v8  }
  0x5a   : > { %375 = vperm.xlu1 %1078, %v204_v9  }
  0x5e   : > { %1079 = vset.pattern.permute.xlu1 %v1148_v12 }
  0x5f   : > { %557 = vperm.xlu1 %1079, %v203_v8  }
  0x90   : > { %v284_v16 = vpop.permute.xlu1 %283  ;;  %v1261_v17 = vpop.permute.xlu0 %291 }
  0x94   : > { %v288_v22 = vpop.permute.xlu1 %287 }
  0x95   : > { %v218_v25 = vpop.permute.xlu0 %217 }
  0x96   : > { %v267_v27 = vmul.f32 %v1264_v21, %v218_v25  ;;  %v266_v28 = vmul.f32 %v1266_v23, %v218_v25  ;;  %v646_v29 = vmul.f32 %v1268_v24, %v218_v25  ;;  %v645_v32 = vmul.f32 %v1270_v26, %v218_v25 }
  0x98   : > { %v315_v36 = vadd.f32 %v284_v16, %v267_v27  ;;  %v662_v38 = vadd.f32 %v646_v29, %v284_v16  ;;  %v314_v39 = vadd.f32 %v284_v16, %v266_v28  ;;  %v661_v50 = vadd.f32 %v645_v32, %v284_v16 }
  0x99   : > { %v223_v30 = vpop.permute.xlu0 %222  ;;  %v233_v31 = vpop.permute.xlu1 %232 }
  0x9a   : > { %v268_v33 = vmul.f32 %v1266_v23, %v223_v30  ;;  %v647_v34 = vmul.f32 %v1270_v26, %v223_v30  ;;  %v269_v35 = vmul.f32 %v1264_v21, %v223_v30  ;;  %v648_v37 = vmul.f32 %v1268_v24, %v223_v30 }
  0x9b   : > { %v273_v41 = vmul.f32 %v1264_v21, %v233_v31  ;;  %v652_v42 = vmul.f32 %v1268_v24, %v233_v31  ;;  %v272_v46 = vmul.f32 %v1266_v23, %v233_v31  ;;  %v651_v51 = vmul.f32 %v1270_v26, %v233_v31 }
  0x9c   : > { %v316_v40 = vadd.f32 %v288_v22, %v268_v33  ;;  %v317_v44 = vadd.f32 %v288_v22, %v269_v35  ;;  %v663_v45 = vadd.f32 %v647_v34, %v288_v22  ;;  %v331_v54 = vmax.f32 %v315_v36, 0.0 }
  0x9d   : > { %v228_v43 = vpop.permute.xlu0 %227  ;;  %v664_v56 = vadd.f32 %v648_v37, %v288_v22  ;;  %v330_v60 = vmax.f32 %v314_v39, 0.0  ;;  %v678_v0 = vmax.f32 %v662_v38, 0.0  ;;  %v677_v1 = vmax.f32 %v661_v50, 0.0 }
  0x9e   : > { %v271_v47 = vmul.f32 %v1264_v21, %v228_v43  ;;  %v650_v48 = vmul.f32 %v1268_v24, %v228_v43  ;;  %v296_v49 = vpop.permute.xlu1 %295  ;;  %v333_v55 = vmax.f32 %v317_v44, 0.0  ;;  %v332_v57 = vmax.f32 %v316_v40, 0.0 }
  0x9f   : > { %v321_v52 = vadd.f32 %v296_v49, %v273_v41  ;;  %v668_v53 = vadd.f32 %v652_v42, %v296_v49  ;;  %v679_v58 = vmax.f32 %v663_v45, 0.0  ;;  %v270_v59 = vmul.f32 %v1266_v23, %v228_v43 }
  0xa0   : > { %v319_v61 = vadd.f32 %v1261_v17, %v271_v47  ;;  %v666_v62 = vadd.f32 %v650_v48, %v1261_v17  ;;  %v320_v63 = vadd.f32 %v296_v49, %v272_v46  ;;  %v987_v3 = vpack.c.bf16 %v333_v55, %v331_v54 }
  0xa1   : > { %v337_v2 = vmax.f32 %v321_v52, 0.0  ;;  %v680_v4 = vmax.f32 %v664_v56, 0.0  ;;  %v989_v6 = vpack.c.bf16 %v332_v57, %v330_v60  ;;  %v684_v7 = vmax.f32 %v668_v53, 0.0  ;;  %v243_v11 = vpop.permute.xlu0 %242 }
  0xa2   : > { %v649_v8 = vmul.f32 %v1270_v26, %v228_v43  ;;  %v667_v9 = vadd.f32 %v651_v51, %v296_v49  ;;  %v1005_v12 = vpack.c.bf16 %v679_v58, %v677_v1  ;;  %988 = vmatprep.subr.bf16.mxu0 %v987_v3  ;;  %v335_v16 = vmax.f32 %v319_v61, 0.0 }
  0xa3   : > { %v238_v5 = vpop.permute.xlu1 %237  ;;  %v1003_v15 = vpack.c.bf16 %v680_v4, %v678_v0  ;;  %v682_v18 = vmax.f32 %v666_v62, 0.0  ;;  %v318_v19 = vadd.f32 %v1261_v17, %v270_v59  ;;  %990 = vmatpush1.bf16.msra.mxu0 %v989_v6  ;;  %v336_v29 = vmax.f32 %v320_v63, 0.0 }
  0xa4   : > { %v274_v20 = vmul.f32 %v1266_v23, %v238_v5  ;;  %v275_v22 = vmul.f32 %v1264_v21, %v238_v5  ;;  %v991_v25 = vpack.c.bf16 %v337_v2, %v335_v16  ;;  %v653_v30 = vmul.f32 %v1270_v26, %v238_v5 }
  0xa5   : > { %1004 = vmatprep.subr.bf16.mxu1 %v1003_v15  ;;  %v1007_v27 = vpack.c.bf16 %v684_v7, %v682_v18  ;;  %v334_v28 = vmax.f32 %v318_v19, 0.0  ;;  %v654_v31 = vmul.f32 %v1268_v24, %v238_v5  ;;  %v665_v32 = vadd.f32 %v649_v8, %v1261_v17  ;;  %v248_v37 = vpop.permute.xlu0 %247 }
  0xa6   : > { %1006 = vmatpush1.bf16.msra.mxu1 %v1005_v12  ;;  %v683_v33 = vmax.f32 %v667_v9, 0.0  ;;  %992 = vmatprep.subr.bf16.mxu0 %v991_v25  ;;  %v276_v42 = vmul.f32 %v1266_v23, %v243_v11  ;;  %v277_v43 = vmul.f32 %v1264_v21, %v243_v11  ;;  %v655_v44 = vmul.f32 %v1270_v26, %v243_v11 }
  0xa7   : > { %1008 = vmatprep.subr.bf16.mxu1 %v1007_v27  ;;  %v993_v35 = vpack.c.bf16 %v336_v29, %v334_v28  ;;  %v681_v38 = vmax.f32 %v665_v32, 0.0  ;;  %v656_v45 = vmul.f32 %v1268_v24, %v243_v11  ;;  %v278_v59 = vmul.f32 %v1266_v23, %v248_v37 }
  0xa8   : > { %v300_v34 = vpop.permute.xlu1 %299  ;;  %v279_v2 = vmul.f32 %v1264_v21, %v248_v37  ;;  %v657_v3 = vmul.f32 %v1270_v26, %v248_v37  ;;  %v658_v4 = vmul.f32 %v1268_v24, %v248_v37  ;;  %v208_v37 = vld [vmem:[%s1435_s2 + $0x18] sm:$0xff] }
  0xa9   : > { %v322_v36 = vadd.f32 %v300_v34, %v274_v20  ;;  %v323_v39 = vadd.f32 %v300_v34, %v275_v22  ;;  %v669_v40 = vadd.f32 %v653_v30, %v300_v34  ;;  %v670_v41 = vadd.f32 %v654_v31, %v300_v34  ;;  %994 = vmatpush1.bf16.msra.mxu0 %v993_v35 }
  0xaa   : > { %v1009_v17 = vpack.c.bf16 %v683_v33, %v681_v38  ;;  %v308_v60 = vpop.permute.xlu0 %307  ;;  %v209_v38 = vld [vmem:[%s1435_s2 + $0x20] sm:$0xff] }
  0xab   : > { %v339_v51 = vmax.f32 %v323_v39, 0.0  ;;  %v686_v52 = vmax.f32 %v670_v41, 0.0  ;;  %v338_v53 = vmax.f32 %v322_v36, 0.0  ;;  %v685_v54 = vmax.f32 %v669_v40, 0.0  ;;  %v207_v36 = vld [vmem:[%s1435_s2 + $0x10] sm:$0xff]  ;;  %v210_v39 = vld [vmem:[%s1435_s2 + $0x28] sm:$0xff] }
  0xac   : > { %v304_v46 = vpop.permute.xlu1 %303  ;;  %1010 = vmatpush1.bf16.msra.mxu1 %v1009_v17  ;;  %v326_v5 = vadd.f32 %v308_v60, %v278_v59  ;;  %v327_v6 = vadd.f32 %v308_v60, %v279_v2  ;;  %v673_v7 = vadd.f32 %v657_v3, %v308_v60  ;;  %v674_v8 = vadd.f32 %v658_v4, %v308_v60  ;;  %v211_v40 = vld [vmem:[%s1435_s2 + $0x30] sm:$0xff]  ;;  %v212_v41 = vld [vmem:[%s1435_s2 + $0x38] sm:$0xff] }
  0xad   : > { %v324_v47 = vadd.f32 %v304_v46, %v276_v42  ;;  %v325_v48 = vadd.f32 %v304_v46, %v277_v43  ;;  %v671_v49 = vadd.f32 %v655_v44, %v304_v46  ;;  %v672_v50 = vadd.f32 %v656_v45, %v304_v46 }
  0xae   : > { %v343_v25 = vmax.f32 %v327_v6, 0.0  ;;  %v690_v27 = vmax.f32 %v674_v8, 0.0  ;;  %v342_v28 = vmax.f32 %v326_v5, 0.0  ;;  %v689_v29 = vmax.f32 %v673_v7, 0.0 }
  0xaf   : > { %v341_v55 = vmax.f32 %v325_v48, 0.0  ;;  %v688_v56 = vmax.f32 %v672_v50, 0.0  ;;  %v340_v57 = vmax.f32 %v324_v47, 0.0  ;;  %v687_v58 = vmax.f32 %v671_v49, 0.0  ;;  %v352_v44 = vpop.permute.xlu0 %351 }
  0xb1   : > { %v253_v61 = vpop.permute.xlu1 %252  ;;  %v995_v62 = vpack.c.bf16 %v341_v55, %v339_v51  ;;  %v1011_v63 = vpack.c.bf16 %v688_v56, %v686_v52  ;;  %v997_v0 = vpack.c.bf16 %v340_v57, %v338_v53  ;;  %v1013_v1 = vpack.c.bf16 %v687_v58, %v685_v54 }
  0xb2   : > { %v280_v9 = vmul.f32 %v1266_v23, %v253_v61  ;;  %v281_v11 = vmul.f32 %v1264_v21, %v253_v61  ;;  %v659_v12 = vmul.f32 %v1270_v26, %v253_v61  ;;  %v660_v15 = vmul.f32 %v1268_v24, %v253_v61  ;;  %v205_v24 = vld [vmem:[%s1435_s2] sm:$0xff]  ;;  %v206_v26 = vld [vmem:[%s1435_s2 + $0x8] sm:$0xff] }
  0xb3   : > { %996 = vmatprep.subr.bf16.mxu0 %v995_v62  ;;  %1012 = vmatprep.subr.bf16.mxu1 %v1011_v63 }
  0xb4   : > { %998 = vmatpush1.bf16.msra.mxu0 %v997_v0  ;;  %1014 = vmatpush1.bf16.msra.mxu1 %v1013_v1  ;;  %v534_v17 = vpop.permute.xlu0 %533 }
  0xb6   : > { %v312_v16 = vpop.permute.xlu1 %311 }
  0xb7   : > { %v328_v18 = vadd.f32 %v312_v16, %v280_v9  ;;  %v329_v19 = vadd.f32 %v312_v16, %v281_v11  ;;  %v675_v20 = vadd.f32 %v659_v12, %v312_v16  ;;  %v676_v22 = vadd.f32 %v660_v15, %v312_v16 }
  0xb8   : > { %v542_v47 = vpop.permute.xlu0 %541 }
  0xb9   : > { %v345_v30 = vmax.f32 %v329_v19, 0.0  ;;  %v692_v31 = vmax.f32 %v676_v22, 0.0  ;;  %v344_v32 = vmax.f32 %v328_v18, 0.0  ;;  %v691_v33 = vmax.f32 %v675_v20, 0.0 }
  0xbb   : > { %v999_v23 = vpack.c.bf16 %v345_v30, %v343_v25  ;;  %v1015_v34 = vpack.c.bf16 %v692_v31, %v690_v27  ;;  %v1001_v21 = vpack.c.bf16 %v344_v32, %v342_v28  ;;  %v1017_v35 = vpack.c.bf16 %v691_v33, %v689_v29  ;;  %v348_v42 = vpop.permute.xlu1 %347 }
  0xbc   : > { %v546_v6 = vpop.permute.xlu0 %545 }
  0xbd   : > { %1000 = vmatprep.subr.bf16.mxu0 %v999_v23  ;;  %1016 = vmatprep.subr.bf16.mxu1 %v1015_v34 }
  0xbe   : > { %1002 = vmatpush1.bf16.msra.mxu0 %v1001_v21  ;;  %1018 = vmatpush1.bf16.msra.mxu1 %v1017_v35 }
  0xbf   : > { %v356_v43 = vpop.permute.xlu1 %355 }
  0xc1   : > { %963 = vmatmul.mubr.msk.f32.vlgmr.msra.gmra.mrb[0].mxu0 %vm378_vm0, %v205_v24  ;;  %972 = vmatmul.mubr.msk.f32.vlgmr.msra.gmra.mrb[0].mxu1 %vm378_vm0, %v205_v24 }
  0xc2   : > { %473 = vmatprep.mubr.f32.mxu0 %v1146_v10  ;;  %763 = vmatprep.mubr.f32.mxu1 %v1146_v10 }
  0xc3   : > { %v1362_v45 = vpop.permute.xlu1 %359 }
  0xc5   : > { %964 = vmatmul.mubr.msk.f32.gmra.mrb[2].mxu0 %vm378_vm0, %v206_v26  ;;  %973 = vmatmul.mubr.msk.f32.gmra.mrb[2].mxu1 %vm378_vm0, %v206_v26 }
  0xc6   : > { %479 = vmatprep.mubr.f32.mxu0 %v1146_v10  ;;  %769 = vmatprep.mubr.f32.mxu1 %v1146_v10 }
  0xc8   : > { %v538_v46 = vpop.permute.xlu1 %537 }
  0xc9   : > { %965 = vmatmul.mubr.msk.f32.gmra.mrb[4].mxu0 %vm378_vm0, %v207_v36  ;;  %974 = vmatmul.mubr.msk.f32.gmra.mrb[4].mxu1 %vm378_vm0, %v207_v36 }
  0xca   : > { %485 = vmatprep.mubr.f32.mxu0 %v1146_v10  ;;  %775 = vmatprep.mubr.f32.mxu1 %v1146_v10 }
  0xcd   : > { %966 = vmatmul.mubr.msk.f32.gmra.mrb[6].mxu0 %vm378_vm0, %v208_v37  ;;  %975 = vmatmul.mubr.msk.f32.gmra.mrb[6].mxu1 %vm378_vm0, %v208_v37  ;;  %v1364_v48 = vpop.permute.xlu1 %363 }
  0xce   : > { %491 = vmatprep.mubr.f32.mxu0 %v1146_v10  ;;  %781 = vmatprep.mubr.f32.mxu1 %v1146_v10 }
  0xd1   : > { %967 = vmatmul.mubr.msk.f32.gmra.mrb[8].mxu0 %vm378_vm0, %v209_v38  ;;  %976 = vmatmul.mubr.msk.f32.gmra.mrb[8].mxu1 %vm378_vm0, %v209_v38  ;;  %v1366_v9 = vpop.permute.xlu1 %367 }
  0xd2   : > { %497 = vmatprep.mubr.f32.mxu0 %v1146_v10  ;;  %787 = vmatprep.mubr.f32.mxu1 %v1146_v10 }
  0xd5   : > { %968 = vmatmul.mubr.msk.f32.gmra.mrb[10].mxu0 %vm378_vm0, %v210_v39  ;;  %977 = vmatmul.mubr.msk.f32.gmra.mrb[10].mxu1 %vm378_vm0, %v210_v39 }
  0xd6   : > { %503 = vmatprep.mubr.f32.mxu0 %v1146_v10  ;;  %793 = vmatprep.mubr.f32.mxu1 %v1146_v10 }
  0xd9   : > { %969 = vmatmul.mubr.msk.f32.gmra.mrb[12].mxu0 %vm378_vm0, %v211_v40  ;;  %978 = vmatmul.mubr.msk.f32.gmra.mrb[12].mxu1 %vm378_vm0, %v211_v40 }
  0xda   : > { %509 = vmatprep.mubr.f32.mxu0 %v1146_v10  ;;  %799 = vmatprep.mubr.f32.mxu1 %v1146_v10 }
  0xdd   : > { %970 = vmatmul.mubr.msk.f32.gmra.mrb[14].mxu0 %vm378_vm0, %v212_v41  ;;  %979 = vmatmul.mubr.msk.f32.gmra.mrb[14].mxu1 %vm378_vm0, %v212_v41 }
 0x194   : > { %v469_v49 = vpop.f32.mrb[0].mxu0  ;;  %v759_v10 = vpop.f32.mrb[0].mxu1 }
 0x195   : > { %v470_v50 = vadd.f32 %v469_v49, %v348_v42  ;;  %v760_v51 = vadd.f32 %v759_v10, %v348_v42  ;;  %v471_v52 = vpop.f32.mrb[1].mxu0  ;;  %v761_v53 = vpop.f32.mrb[1].mxu1 }
 0x196   : > { %v472_v54 = vadd.f32 %v471_v52, %v348_v42  ;;  %v762_v55 = vadd.f32 %v761_v53, %v348_v42 }
 0x197   : > { %v516_v56 = vmax.f32 %v470_v50, 0.0  ;;  %v806_v57 = vmax.f32 %v760_v51, 0.0  ;;  %v550_v51 = vpop.permute.xlu0 %549 }
 0x198   : > { %v517_v58 = vmax.f32 %v472_v54, 0.0  ;;  %v807_v59 = vmax.f32 %v762_v55, 0.0  ;;  %v475_v60 = vpop.f32.mrb[2].mxu0  ;;  %v765_v61 = vpop.f32.mrb[2].mxu1 }
 0x199   : > { %v476_v62 = vadd.f32 %v475_v60, %v352_v44  ;;  %v766_v63 = vadd.f32 %v765_v61, %v352_v44  ;;  %v477_v0 = vpop.f32.mrb[3].mxu0  ;;  %v767_v1 = vpop.f32.mrb[3].mxu1  ;;  %v564_v4 = vmul.f32 %v534_v17, %v516_v56  ;;  %v822_v5 = vmul.f32 %v806_v57, %v534_v17 }
 0x19a   : > { %v478_v2 = vadd.f32 %v477_v0, %v352_v44  ;;  %v768_v3 = vadd.f32 %v767_v1, %v352_v44  ;;  %v565_v11 = vmul.f32 %v534_v17, %v517_v58  ;;  %v823_v12 = vmul.f32 %v807_v59, %v534_v17  ;;  %v372_v54 = vpop.permute.xlu1 %371 }
 0x19b   : > { %v518_v7 = vmax.f32 %v476_v62, 0.0  ;;  %v808_v8 = vmax.f32 %v766_v63, 0.0 }
 0x19c   : > { %v519_v15 = vmax.f32 %v478_v2, 0.0  ;;  %v809_v16 = vmax.f32 %v768_v3, 0.0  ;;  %v481_v18 = vpop.f32.mrb[4].mxu0  ;;  %v771_v19 = vpop.f32.mrb[4].mxu1 }
 0x19d   : > { %v566_v20 = vmul.f32 %v538_v46, %v518_v7  ;;  %v824_v22 = vmul.f32 %v808_v8, %v538_v46  ;;  %v482_v25 = vadd.f32 %v481_v18, %v356_v43  ;;  %v772_v27 = vadd.f32 %v771_v19, %v356_v43  ;;  %v483_v28 = vpop.f32.mrb[5].mxu0  ;;  %v773_v29 = vpop.f32.mrb[5].mxu1 }
 0x19e   : > { %v567_v30 = vmul.f32 %v538_v46, %v519_v15  ;;  %v825_v31 = vmul.f32 %v809_v16, %v538_v46  ;;  %v484_v32 = vadd.f32 %v483_v28, %v356_v43  ;;  %v774_v33 = vadd.f32 %v773_v29, %v356_v43 }
 0x19f   : > { %v580_v23 = vadd.f32 %v566_v20, %v564_v4  ;;  %v838_v34 = vadd.f32 %v824_v22, %v822_v5  ;;  %v520_v21 = vmax.f32 %v482_v25, 0.0  ;;  %v810_v35 = vmax.f32 %v772_v27, 0.0 }
 0x1a0   : > { %v593_v24 = vadd.f32 %v567_v30, %v565_v11  ;;  %v851_v26 = vadd.f32 %v825_v31, %v823_v12  ;;  %v521_v36 = vmax.f32 %v484_v32, 0.0  ;;  %v811_v37 = vmax.f32 %v774_v33, 0.0  ;;  %v487_v38 = vpop.f32.mrb[6].mxu0  ;;  %v777_v39 = vpop.f32.mrb[6].mxu1 }
 0x1a1   : > { %v568_v40 = vmul.f32 %v542_v47, %v520_v21  ;;  %v826_v41 = vmul.f32 %v810_v35, %v542_v47  ;;  %v488_v42 = vadd.f32 %v487_v38, %v1362_v45  ;;  %v778_v44 = vadd.f32 %v777_v39, %v1362_v45  ;;  %v489_v17 = vpop.f32.mrb[7].mxu0  ;;  %v779_v46 = vpop.f32.mrb[7].mxu1 }
 0x1a2   : > { %v569_v49 = vmul.f32 %v542_v47, %v521_v36  ;;  %v827_v43 = vmul.f32 %v811_v37, %v542_v47  ;;  %v490_v10 = vadd.f32 %v489_v17, %v1362_v45  ;;  %v780_v50 = vadd.f32 %v779_v46, %v1362_v45  ;;  %v376_v32 = vpop.permute.xlu1 %375  ;;  %v554_v21 = vpop.permute.xlu0 %553 }
 0x1a3   : > { %v581_v52 = vadd.f32 %v580_v23, %v568_v40  ;;  %v839_v53 = vadd.f32 %v838_v34, %v826_v41  ;;  %v522_v55 = vmax.f32 %v488_v42, 0.0  ;;  %v812_v56 = vmax.f32 %v778_v44, 0.0 }
 0x1a4   : > { %v594_v57 = vadd.f32 %v593_v24, %v569_v49  ;;  %v852_v58 = vadd.f32 %v851_v26, %v827_v43  ;;  %v523_v59 = vmax.f32 %v490_v10, 0.0  ;;  %v813_v60 = vmax.f32 %v780_v50, 0.0  ;;  %v493_v61 = vpop.f32.mrb[8].mxu0  ;;  %v783_v62 = vpop.f32.mrb[8].mxu1 }
 0x1a5   : > { %v570_v63 = vmul.f32 %v546_v6, %v522_v55  ;;  %v828_v0 = vmul.f32 %v812_v56, %v546_v6  ;;  %v494_v47 = vadd.f32 %v493_v61, %v1364_v48  ;;  %v784_v1 = vadd.f32 %v783_v62, %v1364_v48  ;;  %v495_v2 = vpop.f32.mrb[9].mxu0  ;;  %v785_v45 = vpop.f32.mrb[9].mxu1 }
 0x1a6   : > { %v571_v3 = vmul.f32 %v546_v6, %v523_v59  ;;  %v829_v4 = vmul.f32 %v813_v60, %v546_v6  ;;  %v496_v5 = vadd.f32 %v495_v2, %v1364_v48  ;;  %v786_v7 = vadd.f32 %v785_v45, %v1364_v48 }
 0x1a7   : > { %v582_v8 = vadd.f32 %v581_v52, %v570_v63  ;;  %v840_v11 = vadd.f32 %v839_v53, %v828_v0  ;;  %v524_v12 = vmax.f32 %v494_v47, 0.0  ;;  %v814_v15 = vmax.f32 %v784_v1, 0.0  ;;  %v558_v53 = vpop.permute.xlu1 %557 }
 0x1a8   : > { %v595_v16 = vadd.f32 %v594_v57, %v571_v3  ;;  %v853_v18 = vadd.f32 %v852_v58, %v829_v4  ;;  %v525_v19 = vmax.f32 %v496_v5, 0.0  ;;  %v815_v20 = vmax.f32 %v786_v7, 0.0  ;;  %v499_v22 = vpop.f32.mrb[10].mxu0  ;;  %v789_v25 = vpop.f32.mrb[10].mxu1 }
 0x1a9   : > { %v572_v27 = vmul.f32 %v550_v51, %v524_v12  ;;  %v830_v28 = vmul.f32 %v814_v15, %v550_v51  ;;  %v500_v29 = vadd.f32 %v499_v22, %v1366_v9  ;;  %v790_v6 = vadd.f32 %v789_v25, %v1366_v9  ;;  %v501_v30 = vpop.f32.mrb[11].mxu0  ;;  %v791_v31 = vpop.f32.mrb[11].mxu1 }
 0x1aa   : > { %v573_v48 = vmul.f32 %v550_v51, %v525_v19  ;;  %v831_v33 = vmul.f32 %v815_v20, %v550_v51  ;;  %v502_v23 = vadd.f32 %v501_v30, %v1366_v9  ;;  %v792_v34 = vadd.f32 %v791_v31, %v1366_v9 }
 0x1ab   : > { %v583_v35 = vadd.f32 %v582_v8, %v572_v27  ;;  %v841_v24 = vadd.f32 %v840_v11, %v830_v28  ;;  %v526_v26 = vmax.f32 %v500_v29, 0.0  ;;  %v816_v36 = vmax.f32 %v790_v6, 0.0 }
 0x1ac   : > { %v596_v37 = vadd.f32 %v595_v16, %v573_v48  ;;  %v854_v38 = vadd.f32 %v853_v18, %v831_v33  ;;  %v527_v39 = vmax.f32 %v502_v23, 0.0  ;;  %v817_v40 = vmax.f32 %v792_v34, 0.0  ;;  %v505_v41 = vpop.f32.mrb[12].mxu0  ;;  %v795_v42 = vpop.f32.mrb[12].mxu1 }
 0x1ad   : > { %v574_v44 = vmul.f32 %v554_v21, %v526_v26  ;;  %v832_v17 = vmul.f32 %v816_v36, %v554_v21  ;;  %v506_v46 = vadd.f32 %v505_v41, %v372_v54  ;;  %v796_v49 = vadd.f32 %v795_v42, %v372_v54  ;;  %v507_v43 = vpop.f32.mrb[13].mxu0  ;;  %v797_v10 = vpop.f32.mrb[13].mxu1 }
 0x1ae   : > { %v575_v50 = vmul.f32 %v554_v21, %v527_v39  ;;  %v833_v51 = vmul.f32 %v817_v40, %v554_v21  ;;  %v508_v9 = vadd.f32 %v507_v43, %v372_v54  ;;  %v798_v52 = vadd.f32 %v797_v10, %v372_v54  ;;  %v562_v18 = vpop.permute.xlu0 %561 }
 0x1af   : > { %v584_v55 = vadd.f32 %v583_v35, %v574_v44  ;;  %v842_v56 = vadd.f32 %v841_v24, %v832_v17  ;;  %v528_v57 = vmax.f32 %v506_v46, 0.0  ;;  %v818_v58 = vmax.f32 %v796_v49, 0.0 }
 0x1b0   : > { %v597_v59 = vadd.f32 %v596_v37, %v575_v50  ;;  %v855_v60 = vadd.f32 %v854_v38, %v833_v51  ;;  %v529_v61 = vmax.f32 %v508_v9, 0.0  ;;  %v819_v62 = vmax.f32 %v798_v52, 0.0  ;;  %v511_v63 = vpop.f32.mrb[14].mxu0  ;;  %v801_v0 = vpop.f32.mrb[14].mxu1 }
 0x1b1   : > { %v576_v47 = vmul.f32 %v558_v53, %v528_v57  ;;  %v834_v1 = vmul.f32 %v818_v58, %v558_v53  ;;  %v512_v2 = vadd.f32 %v511_v63, %v376_v32  ;;  %v802_v45 = vadd.f32 %v801_v0, %v376_v32  ;;  %v513_v3 = vpop.f32.mrb[15].mxu0  ;;  %v803_v4 = vpop.f32.mrb[15].mxu1 }
 0x1b2   : > { %v577_v5 = vmul.f32 %v558_v53, %v529_v61  ;;  %v835_v7 = vmul.f32 %v819_v62, %v558_v53  ;;  %v514_v54 = vadd.f32 %v513_v3, %v376_v32  ;;  %v804_v8 = vadd.f32 %v803_v4, %v376_v32 }
 0x1b3   : > { %v585_v11 = vadd.f32 %v584_v55, %v576_v47  ;;  %v843_v12 = vadd.f32 %v842_v56, %v834_v1  ;;  %v530_v15 = vmax.f32 %v512_v2, 0.0  ;;  %v820_v16 = vmax.f32 %v802_v45, 0.0 }
 0x1b4   : > { %v598_v19 = vadd.f32 %v597_v59, %v577_v5  ;;  %v856_v20 = vadd.f32 %v855_v60, %v835_v7  ;;  %v531_v22 = vmax.f32 %v514_v54, 0.0  ;;  %v821_v25 = vmax.f32 %v804_v8, 0.0 }
 0x1b5   : > { %v578_v27 = vmul.f32 %v562_v18, %v530_v15  ;;  %v836_v28 = vmul.f32 %v820_v16, %v562_v18  ;;  %v1149_v41 = vmov 1966171168   ;;  %v606_v50 = vstv %s213_s28 }
 0x1b6   : > { %v579_v29 = vmul.f32 %v562_v18, %v531_v22  ;;  %v837_v6 = vmul.f32 %v821_v25, %v562_v18  ;;  %v613_v42 = vunpack.c.l.s4 %v1149_v41 }
 0x1b7   : > { %v586_v30 = vadd.f32 %v585_v11, %v578_v27  ;;  %v844_v31 = vadd.f32 %v843_v12, %v836_v28 }
 0x1b8   : > { %v599_v48 = vadd.f32 %v598_v19, %v579_v29  ;;  %v857_v33 = vadd.f32 %v856_v20, %v837_v6  ;;  %v614_v52 = vunpack.c.0.s8 %v613_v42 }
 0x1b9   : > { %v587_v23 = vrot.slane %v586_v30, 4  ;;  %v845_v34 = vrot.slane %v844_v31, 4 }
 0x1ba   : > { %v600_v32 = vrot.slane %v599_v48, 4  ;;  %v858_v21 = vrot.slane %v857_v33, 4  ;;  %v617_v62 = vsub.s32 %v614_v52, %v1255_v14 }
 0x1bb   : > { %v588_v35 = vadd.f32 %v587_v23, %v586_v30  ;;  %v846_v24 = vadd.f32 %v845_v34, %v844_v31 }
 0x1bc   : > { %v601_v26 = vadd.f32 %v600_v32, %v599_v48  ;;  %v859_v36 = vadd.f32 %v858_v21, %v857_v33 }
 0x1bd   : > { %v589_v37 = vrot.slane %v588_v35, 2  ;;  %v847_v38 = vrot.slane %v846_v24, 2 }
 0x1be   : > { %v602_v39 = vrot.slane %v601_v26, 2  ;;  %v860_v40 = vrot.slane %v859_v36, 2 }
 0x1bf   : > { %v590_v44 = vadd.f32 %v589_v37, %v588_v35  ;;  %v848_v17 = vadd.f32 %v847_v38, %v846_v24 }
 0x1c0   : > { %v603_v46 = vadd.f32 %v602_v39, %v601_v26  ;;  %v861_v49 = vadd.f32 %v860_v40, %v859_v36 }
 0x1c1   : > { %v591_v43 = vrot.slane %v590_v44, 1  ;;  %v849_v10 = vrot.slane %v848_v17, 1 }
 0x1c2   : > { %v604_v51 = vrot.slane %v603_v46, 1  ;;  %v862_v9 = vrot.slane %v861_v49, 1 }
 0x1c3   : > { %v592_v53 = vadd.f32 %v591_v43, %v590_v44  ;;  %v850_v55 = vadd.f32 %v849_v10, %v848_v17 }
 0x1c4   : > { %v605_v56 = vadd.f32 %v604_v51, %v603_v46  ;;  %v863_v57 = vadd.f32 %v862_v9, %v861_v49 }
 0x1c5   : > { %v607_v58 = vadd.f32 %v606_v50, %v592_v53  ;;  %v864_v59 = vadd.f32 %v850_v55, %v606_v50 }
 0x1c6   : > { %v608_v60 = vadd.f32 %v606_v50, %v605_v56  ;;  %v865_v61 = vadd.f32 %v863_v57, %v606_v50 }
 0x1c8   : > { %v611_v63 = vcombine.low %v607_v58, %v608_v60  ;;  %v868_v0 = vcombine.low %v864_v59, %v865_v61 }
 0x1ca   : > { %v618_v47 = vrot.slane %v611_v63, %v617_v62  ;;  %v875_v1 = vrot.slane %v868_v0, %v617_v62 }
 0x1cc   : > { %v625_v2 = vrot.slane %v618_v47, %v617_v62  ;;  %v882_v45 = vrot.slane %v875_v1, %v617_v62 }
 0x1ce   : > { %631 = vst.msk [vmem:[%s190_s6] sm:$0x3] %vm629_vm1, %v625_v2  ;;  %980 = vst.msk [vmem:[%s190_s6 + $0x2] sm:$0x3] %vm629_vm1, %v882_v45 }
 0x1cf   : > { %1093 = shalt.err (!%p1090_p3)
}
 0x1d0   : > { %s1094_s15 = scalar_lea.hbm %s1389_s10, 64  ;;  %s1098_s23 = scalar_lea.hbm %s1437_s4, 128 }
 0x1d1   : > { %p1095_p4 = scmp.ne.s32.totalorder %s1389_s10, %s1094_s15  ;;  %p1099_p9 = scmp.lt.u32.totalorder %s1389_s10, %s1437_s4 }
 0x1d2   : > { %p1100_p10 = scmp.lt.u32.totalorder %s1098_s23, %s1094_s15  ;;  %p1102_p12 = scmp.lt.u32.totalorder %s1094_s15, %s1389_s10 }
 0x1d3   : > { %p1096_p7 = pnand %p1095_p4, %p1217_p5 }
 0x1d4   : > { %p1101_p11 = por %p1100_p10, %p1099_p9 }
 0x1d5   : > { %p1097_p8 = pneg %p1096_p7 }
 0x1d6   : > { %p1103_p13 = por %p1102_p12, %p1101_p11 }
 0x1d8   : > { %p1104_p0 = pnand %p1103_p13, %p1097_p8 }
 0x1da   : > { %1107 = shalt.err (!%p1104_p0)
}
 0x1db   : > { %1019 = dma.vmem_to_hbm [thread:$0]  (%p1217_p5), %s1391_s7, 64, %s1389_s10, %s887_s3  }
 0x1dc PF: > { %p1025_p1 = scmp.ge.s32.totalorder %s1142_s20, 2  ;;  %s913_s29 = sand.u32 1, %s1130_s17  }
 0x1dd   : > { %s914_s30 = scalar_lea.sflag [#allocation4], %s913_s29 }
 0x1de   : > { %p1022_p2 = pnand %p1025_p1, %p1221_p6 }
 0x1e0   : > { %1125 = dma.done.wait (!%p1022_p2), %s914_s30, 64  }
 0x1e1   : > { %1127 = vsyncadd (!%p1022_p2), %s914_s30, 4294967232  ;;  %p15_p3 = scmp.ge.s32.totalorder %s1204_s22, 4   ;;  %s1440_s17 = smov %s1134_s18 }
 0x1e2   : > { %s1441_s18 = smov %s1138_s19  ;;  %s1442_s19 = smov %s1215_s25 }
 0x1e3   : > { %s1443_s20 = smov %s1204_s22  ;;  %17 = sbr.rel (!%p15_p3) target bundleno = 5 (0x5), region = 73 }
 0x1ea   :  { %919 = vsyncpa [#allocation4], 1 }
 0x1eb   :  { %921 = vsyncpa [#allocation4 + $0x1], 1 }

</bundles_post_ra>
